<compile_context>
chip_gen: v7x
topology: tpu7x:2x2x1
jax: 0.10.0
libtpu: 0.0.40
codegen_flags: <defaults>
</compile_context>

<pallas_src>
import functools
import math

import jax
import jax.numpy as jnp
from jax.experimental import pallas as pl
from jax.experimental.pallas import tpu as pltpu


# -----------------------------------------------------------------------------
# Shared forward math (used by both kernels). Inputs are already-loaded arrays.
# -----------------------------------------------------------------------------
def _mlp_forward(y, w1, b1, w2, b2):
    # y: (B, S)  w1: (S, H)  b1: (1, H)  w2: (H, S)  b2: (1, S)
    y3 = y * y * y                                   # y ** 3 on the VPU
    S = y.shape[1]
    if S <= 16:
        # Contraction dim K=S is tiny: first layer as S broadcast multiply-adds
        # on the VPU (exact f32), skipping one MXU round trip entirely.
        # (Python loop unrolls at trace time — S is static and small.)
        h = y3[:, 0:1] * w1[0:1, :] + b1             # (B,1)*(1,H)+(1,H) -> (B,H)
        for k in range(1, S):
            h = h + y3[:, k:k + 1] * w1[k:k + 1, :]
    else:
        h = jnp.dot(y3, w1, preferred_element_type=jnp.float32,
                    precision=jax.lax.Precision.HIGHEST) + b1
    h = jnp.tanh(h)                                  # EUP transcendental
    out = jnp.dot(h, w2, preferred_element_type=jnp.float32,
                  precision=jax.lax.Precision.HIGHEST) + b2      # (B, S) on MXU
    return out


# -----------------------------------------------------------------------------
# Kernel 1: single evaluation (exact VanillaODEFunc.forward). No grid.
# -----------------------------------------------------------------------------
def _ode_func_kernel(y_ref, w1_ref, b1_ref, w2_ref, b2_ref, o_ref):
    out = _mlp_forward(y_ref[...], w1_ref[...], b1_ref[...],
                       w2_ref[...], b2_ref[...])
    o_ref[...] = out.astype(o_ref.dtype)


def vanilla_ode_func(t, y, w1, b1, w2, b2):
    """Single evaluation of the ODE function; matches the PyTorch forward."""
    del t  # unused, kept for ODE-func signature parity
    B, S = y.shape
    vmem = lambda: pl.BlockSpec(memory_space=pltpu.MemorySpace.VMEM)
    return pl.pallas_call(
        _ode_func_kernel,
        out_shape=jax.ShapeDtypeStruct((B, S), y.dtype),
        in_specs=[vmem() for _ in range(5)],
        out_specs=vmem(),
    )(y, w1, b1, w2, b2)


# -----------------------------------------------------------------------------
# Kernel 2: fused explicit-Euler trajectory. One pallas_call for n_steps
# evaluations: weights stay resident in VMEM (constant index_maps => DMA'd
# exactly once), the state y lives in a f32 VMEM scratch accumulator, and the
# output block is written only on the final step.
# -----------------------------------------------------------------------------
def _fused_euler_kernel(y0_ref, w1_ref, b1_ref, w2_ref, b2_ref, o_ref, y_sc,
                        *, dt):
    step = pl.program_id(0)

    @pl.when(step == 0)
    def _():
        y_sc[...] = y0_ref[...].astype(jnp.float32)

    y = y_sc[...]
    f = _mlp_forward(y, w1_ref[...], b1_ref[...], w2_ref[...], b2_ref[...])
    y_sc[...] = y + dt * f

    @pl.when(step == pl.num_programs(0) - 1)
    def _():
        o_ref[...] = y_sc[...].astype(o_ref.dtype)


def vanilla_ode_euler_fused(y0, w1, b1, w2, b2, *, n_steps, dt):
    """n_steps of y <- y + dt * f(t, y), fused into a single kernel launch."""
    B, S = y0.shape
    H = w1.shape[1]
    const2 = lambda i: (0, 0)
    return pl.pallas_call(
        functools.partial(_fused_euler_kernel, dt=float(dt)),
        out_shape=jax.ShapeDtypeStruct((B, S), y0.dtype),
        grid_spec=pltpu.PrefetchScalarGridSpec(
            num_scalar_prefetch=0,
            grid=(n_steps,),
            in_specs=[
                pl.BlockSpec((B, S), const2),   # y0 (read only at step 0)
                pl.BlockSpec((S, H), const2),   # w1 (resident across all steps)
                pl.BlockSpec((1, H), const2),   # b1
                pl.BlockSpec((H, S), const2),   # w2
                pl.BlockSpec((1, S), const2),   # b2
            ],
            out_specs=pl.BlockSpec((B, S), const2),
            scratch_shapes=[pltpu.VMEM((B, S), jnp.float32)],
        ),
        compiler_params=pltpu.CompilerParams(
            dimension_semantics=("arbitrary",)),  # time steps are sequential
    )(y0, w1, b1, w2, b2)


# -----------------------------------------------------------------------------
# Params init (mimics nn.Linear default U(-1/sqrt(fan_in), +1/sqrt(fan_in))).
# -----------------------------------------------------------------------------
def init_params(key, state_size, hidden=50, dtype=jnp.float32):
    k1, k2, k3, k4 = jax.random.split(key, 4)
    bound1 = 1.0 / math.sqrt(state_size)
    bound2 = 1.0 / math.sqrt(hidden)
    # Stored as (in, out) so the kernel uses x @ W directly.
    w1 = jax.random.uniform(k1, (state_size, hidden), dtype, -bound1, bound1)
    b1 = jax.random.uniform(k2, (1, hidden), dtype, -bound1, bound1)
    w2 = jax.random.uniform(k3, (hidden, state_size), dtype, -bound2, bound2)
    b2 = jax.random.uniform(k4, (1, state_size), dtype, -bound2, bound2)
    return w1, b1, w2, b2


def _ref_forward(y, w1, b1, w2, b2):
    hi = jax.lax.Precision.HIGHEST
    h = jnp.tanh(jnp.matmul(y ** 3, w1, precision=hi) + b1)
    return jnp.matmul(h, w2, precision=hi) + b2


if __name__ == "__main__":
    key = jax.random.PRNGKey(0)
    k_y, k_p = jax.random.split(key)

    batch, state_size = 8, 4
    y = jax.random.normal(k_y, (batch, state_size), dtype=jnp.float32)
    t = jnp.float32(0.0)  # unused, as in the PyTorch forward

    w1, b1, w2, b2 = init_params(k_p, state_size)

    # --- single-evaluation kernel (exact module forward) ---
    out = vanilla_ode_func(t, y, w1, b1, w2, b2)
    out = jax.block_until_ready(out)
    ref = _ref_forward(y, w1, b1, w2, b2)
    assert out.shape == (batch, state_size)
    assert jnp.allclose(out, ref, atol=1e-5, rtol=1e-5), "single-eval mismatch"

    # --- fused multi-step kernel (weights resident in VMEM across the loop) ---
    n_steps, dt = 32, 0.05
    y_traj = vanilla_ode_euler_fused(y, w1, b1, w2, b2, n_steps=n_steps, dt=dt)
    y_traj = jax.block_until_ready(y_traj)

    y_ref = y
    for _ in range(n_steps):
        y_ref = y_ref + dt * _ref_forward(y_ref, w1, b1, w2, b2)
    assert y_traj.shape == (batch, state_size)
    assert jnp.allclose(y_traj, y_ref, atol=1e-4, rtol=1e-4), "fused mismatch"

    print("KERNEL_OK")
</pallas_src>

<mosaic_0001>
module attributes {stable_mosaic.version = 11 : i64} {
  func.func @_ode_func_kernel(%arg0: memref<8x4xf32, #tpu.memory_space<vmem>>, %arg1: memref<4x50xf32, #tpu.memory_space<vmem>>, %arg2: memref<1x50xf32, #tpu.memory_space<vmem>>, %arg3: memref<50x4xf32, #tpu.memory_space<vmem>>, %arg4: memref<1x4xf32, #tpu.memory_space<vmem>>, %arg5: memref<8x4xf32, #tpu.memory_space<vmem>>) attributes {dimension_semantics = [], scalar_prefetch = 0 : i64, scratch_operands = 0 : i64, tpu.core_type = #tpu.core_type<tc>} {
    %c0 = arith.constant 0 : index
    %c0_0 = arith.constant 0 : index
    %0 = vector.load %arg0[%c0, %c0_0] : memref<8x4xf32, #tpu.memory_space<vmem>>, vector<8x4xf32>
    %c0_1 = arith.constant 0 : index
    %c0_2 = arith.constant 0 : index
    %1 = vector.load %arg1[%c0_1, %c0_2] : memref<4x50xf32, #tpu.memory_space<vmem>>, vector<4x50xf32>
    %c0_3 = arith.constant 0 : index
    %c0_4 = arith.constant 0 : index
    %2 = vector.load %arg2[%c0_3, %c0_4] : memref<1x50xf32, #tpu.memory_space<vmem>>, vector<1x50xf32>
    %c0_5 = arith.constant 0 : index
    %c0_6 = arith.constant 0 : index
    %3 = vector.load %arg3[%c0_5, %c0_6] : memref<50x4xf32, #tpu.memory_space<vmem>>, vector<50x4xf32>
    %c0_7 = arith.constant 0 : index
    %c0_8 = arith.constant 0 : index
    %4 = vector.load %arg4[%c0_7, %c0_8] : memref<1x4xf32, #tpu.memory_space<vmem>>, vector<1x4xf32>
    %5 = arith.mulf %0, %0 : vector<8x4xf32>
    %6 = arith.mulf %5, %0 : vector<8x4xf32>
    %7 = vector.extract_strided_slice %6 {offsets = [0, 0], sizes = [8, 1], strides = [1, 1]} : vector<8x4xf32> to vector<8x1xf32>
    %8 = vector.extract_strided_slice %1 {offsets = [0, 0], sizes = [1, 50], strides = [1, 1]} : vector<4x50xf32> to vector<1x50xf32>
    %9 = vector.broadcast %7 : vector<8x1xf32> to vector<8x50xf32>
    %10 = vector.broadcast %8 : vector<1x50xf32> to vector<8x50xf32>
    %11 = arith.mulf %9, %10 : vector<8x50xf32>
    %12 = vector.broadcast %2 : vector<1x50xf32> to vector<8x50xf32>
    %13 = arith.addf %11, %12 : vector<8x50xf32>
    %14 = vector.extract_strided_slice %6 {offsets = [0, 1], sizes = [8, 1], strides = [1, 1]} : vector<8x4xf32> to vector<8x1xf32>
    %15 = vector.extract_strided_slice %1 {offsets = [1, 0], sizes = [1, 50], strides = [1, 1]} : vector<4x50xf32> to vector<1x50xf32>
    %16 = vector.broadcast %14 : vector<8x1xf32> to vector<8x50xf32>
    %17 = vector.broadcast %15 : vector<1x50xf32> to vector<8x50xf32>
    %18 = arith.mulf %16, %17 : vector<8x50xf32>
    %19 = arith.addf %13, %18 : vector<8x50xf32>
    %20 = vector.extract_strided_slice %6 {offsets = [0, 2], sizes = [8, 1], strides = [1, 1]} : vector<8x4xf32> to vector<8x1xf32>
    %21 = vector.extract_strided_slice %1 {offsets = [2, 0], sizes = [1, 50], strides = [1, 1]} : vector<4x50xf32> to vector<1x50xf32>
    %22 = vector.broadcast %20 : vector<8x1xf32> to vector<8x50xf32>
    %23 = vector.broadcast %21 : vector<1x50xf32> to vector<8x50xf32>
    %24 = arith.mulf %22, %23 : vector<8x50xf32>
    %25 = arith.addf %19, %24 : vector<8x50xf32>
    %26 = vector.extract_strided_slice %6 {offsets = [0, 3], sizes = [8, 1], strides = [1, 1]} : vector<8x4xf32> to vector<8x1xf32>
    %27 = vector.extract_strided_slice %1 {offsets = [3, 0], sizes = [1, 50], strides = [1, 1]} : vector<4x50xf32> to vector<1x50xf32>
    %28 = vector.broadcast %26 : vector<8x1xf32> to vector<8x50xf32>
    %29 = vector.broadcast %27 : vector<1x50xf32> to vector<8x50xf32>
    %30 = arith.mulf %28, %29 : vector<8x50xf32>
    %31 = arith.addf %25, %30 : vector<8x50xf32>
    %32 = math.tanh %31 : vector<8x50xf32>
    %cst = arith.constant dense<0.000000e+00> : vector<8x4xf32>
    %33 = tpu.matmul %32, %3, %cst {dimension_numbers = #tpu.dot_dimension_numbers<[1], [0], [0], [1], [0, 0, 1, 1], [], []>, precision = #tpu.contract_precision<fp32>} : vector<8x50xf32>, vector<50x4xf32>, vector<8x4xf32> -> vector<8x4xf32>
    %34 = vector.broadcast %4 : vector<1x4xf32> to vector<8x4xf32>
    %35 = arith.addf %33, %34 : vector<8x4xf32>
    %c0_9 = arith.constant 0 : index
    %c0_10 = arith.constant 0 : index
    %36 = vector.load %arg5[%c0_9, %c0_10] : memref<8x4xf32, #tpu.memory_space<vmem>>, vector<8x4xf32>
    tpu.vector_store %arg5[%c0_9, %c0_10], %35 {strides = array<i32>} : memref<8x4xf32, #tpu.memory_space<vmem>>, vector<8x4xf32>,
    return
  }
}

</mosaic_0001>

<bundles_post_ra>
// kernel: tpu_custom_call.1
= control target key start
LH: loop header
LB: loop body
LE: loop exit
PB: predicated region body
PF: predicated region fallthrough
CT: control target
= control target key end

     0   :  { %v855_v0 = vmov 0   ;;  %v856_v2 = vmov 2   ;;  %v857_v5 = vmov 1   ;;  %v858_v6 = vmov 3   ;;  %s1031_s0 = inlined_call_operand.vmem [shape: f32[8,4], index: 0, kind: input, shape index: {}]   ;;  %s1032_s3 = inlined_call_operand.vmem [shape: f32[50,4], index: 3, kind: input, shape index: {}]   ;;  %s1033_s1 = inlined_call_operand.vmem [shape: f32[4,50], index: 1, kind: input, shape index: {}]   ;;  %s1034_s2 = inlined_call_operand.vmem [shape: f32[1,50], index: 2, kind: input, shape index: {}]   ;;  %s1035_s4 = inlined_call_operand.vmem [shape: f32[1,4], index: 4, kind: input, shape index: {}]   ;;  %s1036_s5 = inlined_call_operand.vmem [shape: f32[8,4], index: 5, kind: output, shape index: {}]  }
   0x1   :  { %848 = vset.pattern.permute.xlu0 %v855_v0  ;;  %v20_v1 = vld [vmem:[%s1031_s0] sm:$0xff]  ;;  %850 = vset.pattern.permute.xlu1 %v856_v2  ;;  %v24_v8 = vld [vmem:[%s1032_s3 + $0x8] sm:$0xff]  ;;  %v25_v11 = vld [vmem:[%s1032_s3 + $0x10] sm:$0xff]  ;;  %v859_v14 = vmov 0.0|0.0   ;;  %vm91_vm0 = vcmask 1041408   ;;  %vm860_vm1 = vmmov 0   ;;  %v38_v60 = vlaneseq }
   0x2   :  { %v31_v3 = vmul.f32 %v20_v1, %v20_v1  ;;  %v23_v7 = vld [vmem:[%s1032_s3] sm:$0xff]  ;;  %v99_v10 = vand.u32 4294901760, %v24_v8  ;;  %v26_v12 = vld [vmem:[%s1032_s3 + $0x18] sm:$0xff]  ;;  %804 = vmatprep.subr.bf16.mxu0 %v859_v14  ;;  %777 = vmatprep.subr.bf16.mxu1 %v859_v14  ;;  %v102_v15 = vand.u32 4294901760, %v25_v11  ;;  %v28_v17 = vld [vmem:[%s1032_s3 + $0x28] sm:$0xff]  ;;  %v861_v29 = vmov 0.0  }
   0x3   :  { %v96_v9 = vand.u32 4294901760, %v23_v7  ;;  %v27_v13 = vld [vmem:[%s1032_s3 + $0x20] sm:$0xff]  ;;  %v105_v16 = vand.u32 4294901760, %v26_v12  ;;  %v111_v22 = vand.u32 4294901760, %v28_v17  ;;  %v29_v28 = vld [vmem:[%s1032_s3 + $0x30] sm:$0x3]  ;;  %740 = vmatprep.mubr.msk.f32.mxu0 %vm860_vm1, %v861_v29  ;;  %689 = vmatprep.mubr.msk.f32.mxu1 %vm860_vm1, %v861_v29 }
   0x4   :  { %v32_v4 = vmul.f32 %v31_v3, %v20_v1  ;;  %v108_v18 = vand.u32 4294901760, %v27_v13  ;;  %v919_v21 = vsub.f32 %v24_v8, %v99_v10  ;;  %v921_v23 = vsub.f32 %v25_v11, %v102_v15  ;;  %v21_v63 = vld [vmem:[%s1033_s1] sm:$0xf] }
   0x5   :  { %v915_v19 = vpack.c.bf16 %v99_v10, %v96_v9  ;;  %v917_v20 = vsub.f32 %v23_v7, %v96_v9  ;;  %v923_v24 = vsub.f32 %v26_v12, %v105_v16  ;;  %v929_v26 = vpack.c.bf16 %v105_v16, %v102_v15  ;;  %v625_v8 = vld [vmem:[%s1034_s2] ss:$0 sm:$0xff] }
   0x6   :  { %35 = vperm.xlu0 %848, %v32_v4   ;;  %61 = vperm.xlu1 %850, %v32_v4   ;;  %v925_v25 = vsub.f32 %v27_v13, %v108_v18  ;;  %v931_v27 = vsub.f32 %v28_v17, %v111_v22  ;;  %v944_v30 = vpack.c.bf16 %v111_v22, %v108_v18  ;;  %v948_v31 = vsel %vm91_vm0, %v29_v28, 0 }
   0x7   :  { %806 = vmatpush3.bf16.msra.mxu0 %v915_v19  ;;  %779 = vmatpush3.bf16.msra.mxu1 %v915_v19  ;;  %v953_v32 = vand.u32 4294901760, %v948_v31  ;;  %v180_v33 = vand.u32 4294901760, %v917_v20  ;;  %v187_v34 = vand.u32 4294901760, %v919_v21  ;;  %v194_v40 = vand.u32 4294901760, %v921_v23 }
   0x8   :  { %807 = vmatprep.subr.bf16.mxu0 %v859_v14  ;;  %780 = vmatprep.subr.bf16.mxu1 %v859_v14  ;;  %v201_v41 = vand.u32 4294901760, %v923_v24  ;;  %v208_v48 = vand.u32 4294901760, %v925_v25  ;;  %v215_v49 = vand.u32 4294901760, %v931_v27  ;;  %v796_v57 = vpack.c.bf16 %v919_v21, %v917_v20 }
   0x9   :  { %v960_v35 = vpack.c.bf16 %v187_v34, %v180_v33  ;;  %v181_v36 = vsub.f32 %v917_v20, %v180_v33  ;;  %v188_v37 = vsub.f32 %v919_v21, %v187_v34  ;;  %v195_v44 = vsub.f32 %v921_v23, %v194_v40  ;;  %v626_v21 = vld [vmem:[%s1035_s4] ss:$0 sm:$0xff] }
   0xa   :  { %849 = vset.pattern.permute.xlu0 %v857_v5  ;;  %851 = vset.pattern.permute.xlu1 %v858_v6  ;;  %v817_v43 = vpack.c.bf16 %v201_v41, %v194_v40  ;;  %v202_v45 = vsub.f32 %v923_v24, %v201_v41  ;;  %v820_v51 = vpack.c.bf16 %v215_v49, %v208_v48  ;;  %v39_v61 = vshrl.u32 %v38_v60, 7 }
   0xb   :  { %51 = vperm.xlu0 %849, %v32_v4   ;;  %71 = vperm.xlu1 %851, %v32_v4   ;;  %v182_v38 = vand.u32 4294901760, %v181_v36  ;;  %v189_v39 = vand.u32 4294901760, %v188_v37  ;;  %v196_v46 = vand.u32 4294901760, %v195_v44  ;;  %v209_v52 = vsub.f32 %v925_v25, %v208_v48 }
   0xc   :  { %809 = vmatpush3.bf16.msra.mxu0 %v929_v26  ;;  %782 = vmatpush3.bf16.msra.mxu1 %v929_v26  ;;  %v203_v47 = vand.u32 4294901760, %v202_v45  ;;  %v216_v53 = vsub.f32 %v931_v27, %v215_v49  ;;  %v799_v58 = vpack.c.bf16 %v923_v24, %v921_v23  ;;  %v802_v59 = vpack.c.bf16 %v931_v27, %v925_v25 }
   0xd   :  { %810 = vmatprep.subr.bf16.mxu0 %v859_v14  ;;  %783 = vmatprep.subr.bf16.mxu1 %v859_v14  ;;  %v787_v42 = vpack.c.bf16 %v189_v39, %v182_v38  ;;  %v210_v54 = vand.u32 4294901760, %v209_v52  ;;  %v40_v62 = vsub.s32 0, %v39_v61  ;;  %v56_v1 = vsub.s32 1, %v39_v61 }
   0xe   :  { %v790_v50 = vpack.c.bf16 %v203_v47, %v196_v46  ;;  %v217_v55 = vand.u32 4294901760, %v216_v53  ;;  %v66_v3 = vsub.s32 2, %v39_v61  ;;  %v76_v5 = vsub.s32 3, %v39_v61 }
   0xf   :  { %852 = vset.pattern.permute.xlu0 %v858_v6  ;;  %v41_v0 = vrot.slane %v21_v63, %v40_v62  ;;  %v57_v7 = vrot.slane %v21_v63, %v56_v1  ;;  %vm87_vm2 = vcmask 408576   ;;  %v221_v40 = vsub.f32 %v948_v31, %v953_v32 }
  0x10   :  { %812 = vmatpush3.bf16.msra.mxu0 %v944_v30  ;;  %785 = vmatpush3.bf16.msra.mxu1 %v944_v30  ;;  %v793_v56 = vpack.c.bf16 %v217_v55, %v210_v54  ;;  %v67_v9 = vrot.slane %v21_v63, %v66_v3  ;;  %v77_v10 = vrot.slane %v21_v63, %v76_v5  ;;  %vm619_vm3 = vcmask 31744  }
  0x11   :  { %738 = vmatprep.subr.mxu0 %v861_v29  ;;  %687 = vmatprep.subr.mxu1 %v861_v29  ;;  %v222_v44 = vand.u32 4294901760, %v221_v40 }
  0x13   :  { %v223_v31 = vsub.f32 %v221_v40, %v222_v44 }
  0x14   :  { %739 = vmatpush3.msra.mxu0 %v953_v32  ;;  %688 = vmatpush3.msra.mxu1 %v953_v32 }
  0x15   :  { %813 = vmatprep.subr.bf16.mxu0 %v859_v14  ;;  %786 = vmatprep.subr.bf16.mxu1 %v859_v14 }
  0x85   :  { %v36_v2 = vpop.permute.xlu0 %35  ;;  %v62_v4 = vpop.permute.xlu1 %61 }
  0x86   :  { %v42_v6 = vmul.f32 %v41_v0, %v36_v2  ;;  %v68_v16 = vmul.f32 %v67_v9, %v62_v4 }
  0x88   :  { %v49_v13 = vadd.f32 %v625_v8, %v42_v6 }
  0x8a   :  { %v52_v11 = vpop.permute.xlu0 %51  ;;  %v72_v12 = vpop.permute.xlu1 %71 }
  0x8b   :  { %v58_v15 = vmul.f32 %v57_v7, %v52_v11  ;;  %v78_v18 = vmul.f32 %v77_v10, %v72_v12 }
  0x8d   :  { %v59_v17 = vadd.f32 %v58_v15, %v49_v13 }
  0x8f   :  { %v69_v22 = vadd.f32 %v68_v16, %v59_v17 }
  0x91   :  { %v79_v28 = vadd.f32 %v78_v18, %v69_v22 }
  0x93   :  { %853 = vtanh.f32 %v79_v28 }
  0x9d   :  { %v854_v33 = vpop.eup %853 }
  0x9e   :  { %v89_v34 = vsel %vm87_vm2, %v854_v33, 0 }
  0x9f   :  { %v167_v36 = vand.u32 4294901760, %v89_v34 }
  0xa1   :  { %v168_v37 = vsub.f32 %v89_v34, %v167_v36 }
  0xa3   :  { %v169_v38 = vand.u32 4294901760, %v168_v37 }
  0xa5   :  { %741 = vmatmul.mubr.f32.vlgmr.msra.gmra.mrb[0].mxu0 %v169_v38  ;;  %v170_v39 = vsub.f32 %v168_v37, %v169_v38 }
  0xa6   :  { %815 = vmatpush3.bf16.msra.mxu0 %v960_v35  ;;  %757 = vmatprep.mubr.msk.f32.mxu0 %vm860_vm1, %v861_v29  ;;  %v224_v35 = vand.u32 4294901760, %v223_v31 }
  0xa7   :  { %816 = vmatprep.subr.bf16.mxu0 %v859_v14  ;;  %v171_v41 = vand.u32 4294901760, %v170_v39 }
  0xa9   :  { %690 = vmatmul.mubr.f32.vlgmr.msra.gmra.mrb[0].mxu1 %v171_v41 }
  0xaa   :  { %788 = vmatpush3.bf16.msra.mxu1 %v787_v42  ;;  %818 = vmatpush3.bf16.msra.mxu0 %v817_v43 }
  0xab   :  { %789 = vmatprep.subr.bf16.mxu1 %v859_v14  ;;  %819 = vmatprep.subr.bf16.mxu0 %v859_v14 }
  0xac   :  { %706 = vmatprep.mubr.msk.f32.mxu1 %vm860_vm1, %v861_v29 }
  0xae   :  { %791 = vmatpush3.bf16.msra.mxu1 %v790_v50  ;;  %821 = vmatpush3.bf16.msra.mxu0 %v820_v51 }
  0xaf   :  { %792 = vmatprep.subr.bf16.mxu1 %v859_v14  ;;  %755 = vmatprep.subr.mxu0 %v861_v29 }
  0xb2   :  { %794 = vmatpush3.bf16.msra.mxu1 %v793_v56  ;;  %756 = vmatpush3.msra.mxu0 %v222_v44 }
  0xb3   :  { %758 = vmatmul.mubr.f32.vlgmr.msra.gmra.mrb[0].mxu0 %v167_v36  ;;  %822 = vmatprep.subr.bf16.mxu0 %v859_v14 }
  0xb4   :  { %824 = vmatpush3.bf16.msra.mxu0 %v915_v19  ;;  %704 = vmatprep.subr.mxu1 %v861_v29 }
  0xb5   :  { %825 = vmatprep.subr.bf16.mxu0 %v859_v14  ;;  %774 = vmatprep.mubr.msk.f32.mxu0 %vm860_vm1, %v861_v29 }
  0xb6   :  { %705 = vmatpush3.msra.mxu1 %v224_v35 }
  0xb7   :  { %707 = vmatmul.mubr.f32.vlgmr.msra.gmra.mrb[0].mxu1 %v167_v36  ;;  %795 = vmatprep.subr.bf16.mxu1 %v859_v14 }
  0xb8   :  { %797 = vmatpush3.bf16.msra.mxu1 %v796_v57  ;;  %827 = vmatpush3.bf16.msra.mxu0 %v929_v26 }
  0xb9   :  { %798 = vmatprep.subr.bf16.mxu1 %v859_v14  ;;  %828 = vmatprep.subr.bf16.mxu0 %v859_v14 }
  0xba   :  { %723 = vmatprep.mubr.msk.f32.mxu1 %vm860_vm1, %v861_v29 }
  0xbc   :  { %800 = vmatpush3.bf16.msra.mxu1 %v799_v58  ;;  %830 = vmatpush3.bf16.msra.mxu0 %v944_v30 }
  0xbd   :  { %801 = vmatprep.subr.bf16.mxu1 %v859_v14  ;;  %772 = vmatprep.subr.mxu0 %v861_v29 }
  0xc0   :  { %803 = vmatpush3.bf16.msra.mxu1 %v802_v59  ;;  %773 = vmatpush3.msra.mxu0 %v953_v32 }
  0xc1   :  { %775 = vmatmul.mubr.f32.vlgmr.msra.gmra.mrb[0].mxu0 %v167_v36  ;;  %721 = vmatprep.subr.mxu1 %v861_v29 }
  0xc4   :  { %722 = vmatpush3.msra.mxu1 %v221_v40 }
  0xc5   :  { %724 = vmatmul.mubr.f32.vlgmr.msra.gmra.mrb[0].mxu1 %v168_v37 }
 0x194   :  { %v615_v19 = vpop.f32.mrb[0].mxu0 }
 0x195   :  { %v776_v20 = vpop.f32.mrb[1].mxu0 }
 0x198   :  { %v365_v14 = vpop.f32.mrb[0].mxu1 }
 0x199   :  { %v831_v23 = vadd.f32 %v626_v21, %v365_v14  ;;  %v725_v24 = vpop.f32.mrb[1].mxu1 }
 0x19b   :  { %v832_v26 = vadd.f32 %v831_v23, %v615_v19 }
 0x19d   :  { %620 = vst.msk [vmem:[%s1036_s5] sm:$0xff] %vm619_vm3, %v832_v26 }

</bundles_post_ra>
